<compile_context>
chip_gen: v6e
topology: v6e:2x2x1
jax: 0.10.0
libtpu: 0.0.40
codegen_flags: <defaults>
</compile_context>

<pallas_src>
import functools

import numpy as np
import jax
import jax.numpy as jnp
from jax.experimental import pallas as pl
from jax.experimental.pallas import tpu as pltpu


def _st_gcn_kernel(kt, pad, VC, x_ref, wcat_ref, bcat_ref, wt_ref, o_ref):
    # x_ref: (1, T, V*Cin)   wcat_ref: (V*Cin, 2*V*Cout)   bcat_ref: (1, 2*V*Cout)
    # wt_ref: (kt, V*Cout, V*Cout)   o_ref: (1, T, V*Cout)
    T = x_ref.shape[1]
    x2 = x_ref[0]                                              # (T, V*Cin)

    # Fused GCN(+A+bias+BN1-scale) and residual(+BN_r) 1x1 convs: one matmul,
    # shared LHS, lane-dense 256-wide output.
    z = jnp.dot(x2, wcat_ref[...], preferred_element_type=jnp.float32) + bcat_ref[...]

    h = jnp.maximum(z[:, :VC], 0.0)        # BN1 + ReLU (scale in weight, shift in bias)
    acc = z[:, VC:]                        # residual + BN_r + (b_tcn*s2 + t2) shift

    # Temporal conv (kt, 1), stride 1: register-resident shifted rows, no scratch.
    row = jax.lax.broadcasted_iota(jnp.int32, (T, VC), 0)
    for dt in range(kt):                                       # kt is small & static
        s = dt - pad
        if s == 0:
            hs = h
        else:
            hs = pltpu.roll(h, shift=(-s) % T, axis=0)         # XLU sublane rotate
            hs = jnp.where((row + s >= 0) & (row + s < T), hs, 0.0)
        acc = acc + jnp.dot(hs, wt_ref[dt], preferred_element_type=jnp.float32)

    # Dropout(p=0) is identity; final ReLU.
    o_ref[0] = jnp.maximum(acc, 0.0)


def _fold_params(A, p, *, K, Cin, Cout, V, kt):
    """Host-side folding of A, conv biases and eval-mode BN into big weights."""
    s1, t1 = p['bn1_scale'][0], p['bn1_shift'][0]
    s2, t2 = p['bn2_scale'][0], p['bn2_shift'][0]
    sr, tr = p['bnr_scale'][0], p['bnr_shift'][0]
    VCin, VC = V * Cin, V * Cout

    # GCN conv + graph aggregation + BN1 scale -> one (V*Cin, V*Cout) weight.
    wg = p['w_gcn'].reshape(Cin, K, Cout)                              # [i, k, c]
    wg_big = (jnp.einsum('kvw,ikc->viwc', A, wg) * s1).reshape(VCin, VC)
    # GCN conv bias propagated through A (vertex-dependent), then through BN1.
    bg = p['b_gcn'][0].reshape(K, Cout)
    shift1 = (jnp.einsum('kw,kc->wc', A.sum(axis=1), bg) * s1 + t1).reshape(VC)

    eye = jnp.eye(V, dtype=jnp.float32)
    # Residual 1x1 conv (+ BN_r scale) as a vertex-block-diagonal weight.
    wr_big = jnp.einsum('vw,ic->viwc', eye, p['w_res'] * sr).reshape(VCin, VC)
    # Residual shift + tcn-output shift (both added after the temporal conv).
    shift_res = jnp.tile(p['b_res'][0] * sr + tr + p['b_tcn'][0] * s2 + t2, V)

    w_cat = jnp.concatenate([wg_big, wr_big], axis=1)                  # (VCin, 2*VC)
    b_cat = jnp.concatenate([shift1, shift_res])[None, :]              # (1, 2*VC)

    # Temporal conv taps (+ BN2 scale) as block-diagonal (VC, VC) weights.
    wt_big = jnp.einsum('wx,dbc->dwbxc', eye, p['w_tcn'] * s2).reshape(kt, VC, VC)
    return w_cat, b_cat, wt_big


def st_gcn_forward(x_nctv, A, p, *, K, Cout, kt, pad):
    """x_nctv: (N, Cin, T, V) float32. Returns (N, Cout, T, V) float32."""
    N, Cin, T, V = x_nctv.shape
    VCin, VC = V * Cin, V * Cout
    w_cat, b_cat, wt_big = _fold_params(A, p, K=K, Cin=Cin, Cout=Cout, V=V, kt=kt)

    # DMA-compact, lane-dense kernel input: (N, T, V*Cin).
    x_flat = jnp.transpose(x_nctv, (0, 2, 3, 1)).reshape(N, T, VCin)

    kern = functools.partial(_st_gcn_kernel, kt, pad, VC)
    out_flat = pl.pallas_call(
        kern,
        out_shape=jax.ShapeDtypeStruct((N, T, VC), jnp.float32),
        grid=(N,),  # keep >=2 parallel steps so v7x megacore gets both TCs
        in_specs=[
            pl.BlockSpec((1, T, VCin), lambda n: (n, 0, 0)),       # x
            pl.BlockSpec((VCin, 2 * VC), lambda n: (0, 0)),        # fused gcn+res weight
            pl.BlockSpec((1, 2 * VC), lambda n: (0, 0)),           # fused shifts
            pl.BlockSpec((kt, VC, VC), lambda n: (0, 0, 0)),       # temporal weights
        ],
        out_specs=pl.BlockSpec((1, T, VC), lambda n: (n, 0, 0)),   # lane-dense output
        compiler_params=pltpu.CompilerParams(dimension_semantics=("parallel",)),
    )(x_flat, w_cat, b_cat, wt_big)

    return jnp.transpose(out_flat.reshape(N, T, V, Cout), (0, 3, 1, 2))


def st_gcn_ref(x_nctv, A, p, *, K, Cout, kt, pad):
    """Pure-JAX reference in PyTorch NCTV layout (eval-mode BN, dropout p=0)."""
    N, Cin, T, V = x_nctv.shape
    y = jnp.einsum('nctv,co->notv', x_nctv, p['w_gcn']) + p['b_gcn'][0][None, :, None, None]
    y = y.reshape(N, K, Cout, T, V)
    g = jnp.einsum('nkctv,kvw->nctw', y, A)
    h = jnp.maximum(g * p['bn1_scale'][0][None, :, None, None]
                    + p['bn1_shift'][0][None, :, None, None], 0.0)
    hp = jnp.pad(h, ((0, 0), (0, 0), (pad, pad), (0, 0)))
    out = jnp.zeros((N, Cout, T, V), jnp.float32) + p['b_tcn'][0][None, :, None, None]
    for dt in range(kt):
        out = out + jnp.einsum('nctv,cd->ndtv', hp[:, :, dt:dt + T, :], p['w_tcn'][dt])
    out = out * p['bn2_scale'][0][None, :, None, None] + p['bn2_shift'][0][None, :, None, None]
    res = jnp.einsum('nctv,cd->ndtv', x_nctv, p['w_res']) + p['b_res'][0][None, :, None, None]
    res = res * p['bnr_scale'][0][None, :, None, None] + p['bnr_shift'][0][None, :, None, None]
    return jnp.maximum(out + res, 0.0)


def _bn_fold(kg, kb, km, kv, C, eps=1e-5):
    gamma = 1.0 + 0.1 * jax.random.normal(kg, (C,))
    beta = 0.1 * jax.random.normal(kb, (C,))
    mean = 0.1 * jax.random.normal(km, (C,))
    var = 1.0 + 0.1 * jax.random.uniform(kv, (C,))
    scale = gamma / jnp.sqrt(var + eps)
    shift = beta - mean * scale
    return (scale[None, :].astype(jnp.float32), shift[None, :].astype(jnp.float32))


if __name__ == "__main__":
    # st_gcn(in_channels=4, out_channels=8, kernel_size=(3, 3), stride=1, residual=True)
    N, Cin, Cout, T, V = 2, 4, 8, 8, 16
    kt, K = 3, 3                      # temporal / graph kernel sizes
    pad = (kt - 1) // 2

    keys = jax.random.split(jax.random.PRNGKey(0), 24)

    params = {
        # Conv2d(Cin, K*Cout, (1,1))  -> stored as (Cin, K*Cout) for right-matmul
        'w_gcn': (0.2 * jax.random.normal(keys[0], (Cin, K * Cout))).astype(jnp.float32),
        'b_gcn': (0.1 * jax.random.normal(keys[1], (1, K * Cout))).astype(jnp.float32),
        # Conv2d(Cout, Cout, (kt,1)) -> stored as (kt, Cout_in, Cout_out)
        'w_tcn': (0.2 * jax.random.normal(keys[2], (kt, Cout, Cout))).astype(jnp.float32),
        'b_tcn': (0.1 * jax.random.normal(keys[3], (1, Cout))).astype(jnp.float32),
        # residual Conv2d(Cin, Cout, 1) -> stored as (Cin, Cout)
        'w_res': (0.2 * jax.random.normal(keys[4], (Cin, Cout))).astype(jnp.float32),
        'b_res': (0.1 * jax.random.normal(keys[5], (1, Cout))).astype(jnp.float32),
    }
    params['bn1_scale'], params['bn1_shift'] = _bn_fold(keys[6], keys[7], keys[8], keys[9], Cout)
    params['bn2_scale'], params['bn2_shift'] = _bn_fold(keys[10], keys[11], keys[12], keys[13], Cout)
    params['bnr_scale'], params['bnr_shift'] = _bn_fold(keys[14], keys[15], keys[16], keys[17], Cout)

    # Inputs (PyTorch convention): x (N, Cin, T, V), A (K, V, V)
    x_nctv = jax.random.normal(keys[18], (N, Cin, T, V), dtype=jnp.float32)
    A = (0.3 * jax.random.normal(keys[19], (K, V, V))).astype(jnp.float32)

    out_nctv = st_gcn_forward(x_nctv, A, params, K=K, Cout=Cout, kt=kt, pad=pad)
    out_nctv = jax.block_until_ready(out_nctv)

    ref = st_gcn_ref(x_nctv, A, params, K=K, Cout=Cout, kt=kt, pad=pad)
    np.testing.assert_allclose(np.asarray(out_nctv), np.asarray(ref), rtol=1e-4, atol=1e-4)

    print("KERNEL_OK")
</pallas_src>

<mosaic_0001>
module attributes {stable_mosaic.version = 11 : i64} {
  func.func @_st_gcn_kernel(%arg0: i32, %arg1: memref<1x8x64xf32, #tpu.memory_space<vmem>>, %arg2: memref<64x256xf32, #tpu.memory_space<vmem>>, %arg3: memref<1x256xf32, #tpu.memory_space<vmem>>, %arg4: memref<3x128x128xf32, #tpu.memory_space<vmem>>, %arg5: memref<1x8x128xf32, #tpu.memory_space<vmem>>) attributes {dimension_semantics = [#tpu.dimension_semantics<parallel>], iteration_bounds = array<i64: 2>, scalar_prefetch = 0 : i64, scratch_operands = 0 : i64, tpu.core_type = #tpu.core_type<tc>, window_params = [{transform_indices = @transform_0, window_bounds = array<i64: 1, 8, 64>}, {pipeline_mode = #tpu.pipeline_mode<synchronous>, transform_indices = @transform_1, window_bounds = array<i64: 64, 256>}, {pipeline_mode = #tpu.pipeline_mode<synchronous>, transform_indices = @transform_2, window_bounds = array<i64: 1, 256>}, {pipeline_mode = #tpu.pipeline_mode<synchronous>, transform_indices = @transform_3, window_bounds = array<i64: 3, 128, 128>}, {transform_indices = @transform_4, window_bounds = array<i64: 1, 8, 128>}]} {
    %c0 = arith.constant 0 : index
    %c0_0 = arith.constant 0 : index
    %c0_1 = arith.constant 0 : index
    %0 = vector.load %arg1[%c0, %c0_0, %c0_1] : memref<1x8x64xf32, #tpu.memory_space<vmem>>, vector<1x8x64xf32>
    %1 = vector.shape_cast %0 : vector<1x8x64xf32> to vector<8x64xf32>
    %c0_2 = arith.constant 0 : index
    %c0_3 = arith.constant 0 : index
    %2 = vector.load %arg2[%c0_2, %c0_3] : memref<64x256xf32, #tpu.memory_space<vmem>>, vector<64x256xf32>
    %cst = arith.constant dense<0.000000e+00> : vector<8x256xf32>
    %3 = tpu.matmul %1, %2, %cst {dimension_numbers = #tpu.dot_dimension_numbers<[1], [0], [0], [1], [0, 0, 1, 1], [], []>} : vector<8x64xf32>, vector<64x256xf32>, vector<8x256xf32> -> vector<8x256xf32>
    %c0_4 = arith.constant 0 : index
    %c0_5 = arith.constant 0 : index
    %4 = vector.load %arg3[%c0_4, %c0_5] : memref<1x256xf32, #tpu.memory_space<vmem>>, vector<1x256xf32>
    %5 = vector.broadcast %4 : vector<1x256xf32> to vector<8x256xf32>
    %6 = arith.addf %3, %5 : vector<8x256xf32>
    %7 = vector.extract_strided_slice %6 {offsets = [0, 0], sizes = [8, 128], strides = [1, 1]} : vector<8x256xf32> to vector<8x128xf32>
    %cst_6 = arith.constant 0.000000e+00 : f32
    %8 = vector.broadcast %cst_6 : f32 to vector<8x128xf32>
    %9 = arith.maximumf %7, %8 : vector<8x128xf32>
    %10 = vector.extract_strided_slice %6 {offsets = [0, 128], sizes = [8, 128], strides = [1, 1]} : vector<8x256xf32> to vector<8x128xf32>
    %11 = tpu.iota {dimensions = array<i32: 0>} : vector<8x128xi32>
    %c1_i32 = arith.constant 1 : i32
    %12 = tpu.dynamic_rotate %9 by %c1_i32 dim 0 : vector<8x128xf32>, i32 -> vector<8x128xf32>
    %c-1_i32 = arith.constant -1 : i32
    %13 = vector.broadcast %c-1_i32 : i32 to vector<8x128xi32>
    %14 = arith.addi %11, %13 : vector<8x128xi32>
    %c0_i32 = arith.constant 0 : i32
    %15 = vector.broadcast %c0_i32 : i32 to vector<8x128xi32>
    %16 = arith.cmpi sge, %14, %15 : vector<8x128xi32>
    %c-1_i32_7 = arith.constant -1 : i32
    %17 = vector.broadcast %c-1_i32_7 : i32 to vector<8x128xi32>
    %18 = arith.addi %11, %17 : vector<8x128xi32>
    %c8_i32 = arith.constant 8 : i32
    %19 = vector.broadcast %c8_i32 : i32 to vector<8x128xi32>
    %20 = arith.cmpi slt, %18, %19 : vector<8x128xi32>
    %21 = arith.andi %16, %20 : vector<8x128xi1>
    %cst_8 = arith.constant 0.000000e+00 : f32
    %22 = vector.broadcast %cst_8 : f32 to vector<8x128xf32>
    %23 = arith.select %21, %12, %22 : vector<8x128xi1>, vector<8x128xf32>
    %c0_9 = arith.constant 0 : index
    %c0_10 = arith.constant 0 : index
    %c0_11 = arith.constant 0 : index
    %24 = vector.load %arg4[%c0_9, %c0_10, %c0_11] : memref<3x128x128xf32, #tpu.memory_space<vmem>>, vector<1x128x128xf32>
    %25 = vector.shape_cast %24 : vector<1x128x128xf32> to vector<128x128xf32>
    %cst_12 = arith.constant dense<0.000000e+00> : vector<8x128xf32>
    %26 = tpu.matmul %23, %25, %cst_12 {dimension_numbers = #tpu.dot_dimension_numbers<[1], [0], [0], [1], [0, 0, 1, 1], [], []>} : vector<8x128xf32>, vector<128x128xf32>, vector<8x128xf32> -> vector<8x128xf32>
    %27 = arith.addf %10, %26 : vector<8x128xf32>
    %c1 = arith.constant 1 : index
    %c0_13 = arith.constant 0 : index
    %c0_14 = arith.constant 0 : index
    %28 = vector.load %arg4[%c1, %c0_13, %c0_14] : memref<3x128x128xf32, #tpu.memory_space<vmem>>, vector<1x128x128xf32>
    %29 = vector.shape_cast %28 : vector<1x128x128xf32> to vector<128x128xf32>
    %cst_15 = arith.constant dense<0.000000e+00> : vector<8x128xf32>
    %30 = tpu.matmul %9, %29, %cst_15 {dimension_numbers = #tpu.dot_dimension_numbers<[1], [0], [0], [1], [0, 0, 1, 1], [], []>} : vector<8x128xf32>, vector<128x128xf32>, vector<8x128xf32> -> vector<8x128xf32>
    %31 = arith.addf %27, %30 : vector<8x128xf32>
    %c7_i32 = arith.constant 7 : i32
    %32 = tpu.dynamic_rotate %9 by %c7_i32 dim 0 : vector<8x128xf32>, i32 -> vector<8x128xf32>
    %c1_i32_16 = arith.constant 1 : i32
    %33 = vector.broadcast %c1_i32_16 : i32 to vector<8x128xi32>
    %34 = arith.addi %11, %33 : vector<8x128xi32>
    %c0_i32_17 = arith.constant 0 : i32
    %35 = vector.broadcast %c0_i32_17 : i32 to vector<8x128xi32>
    %36 = arith.cmpi sge, %34, %35 : vector<8x128xi32>
    %c1_i32_18 = arith.constant 1 : i32
    %37 = vector.broadcast %c1_i32_18 : i32 to vector<8x128xi32>
    %38 = arith.addi %11, %37 : vector<8x128xi32>
    %c8_i32_19 = arith.constant 8 : i32
    %39 = vector.broadcast %c8_i32_19 : i32 to vector<8x128xi32>
    %40 = arith.cmpi slt, %38, %39 : vector<8x128xi32>
    %41 = arith.andi %36, %40 : vector<8x128xi1>
    %cst_20 = arith.constant 0.000000e+00 : f32
    %42 = vector.broadcast %cst_20 : f32 to vector<8x128xf32>
    %43 = arith.select %41, %32, %42 : vector<8x128xi1>, vector<8x128xf32>
    %c2 = arith.constant 2 : index
    %c0_21 = arith.constant 0 : index
    %c0_22 = arith.constant 0 : index
    %44 = vector.load %arg4[%c2, %c0_21, %c0_22] : memref<3x128x128xf32, #tpu.memory_space<vmem>>, vector<1x128x128xf32>
    %45 = vector.shape_cast %44 : vector<1x128x128xf32> to vector<128x128xf32>
    %cst_23 = arith.constant dense<0.000000e+00> : vector<8x128xf32>
    %46 = tpu.matmul %43, %45, %cst_23 {dimension_numbers = #tpu.dot_dimension_numbers<[1], [0], [0], [1], [0, 0, 1, 1], [], []>} : vector<8x128xf32>, vector<128x128xf32>, vector<8x128xf32> -> vector<8x128xf32>
    %47 = arith.addf %31, %46 : vector<8x128xf32>
    %cst_24 = arith.constant 0.000000e+00 : f32
    %48 = vector.broadcast %cst_24 : f32 to vector<8x128xf32>
    %49 = arith.maximumf %47, %48 : vector<8x128xf32>
    %c0_25 = arith.constant 0 : index
    %c0_26 = arith.constant 0 : index
    %c0_27 = arith.constant 0 : index
    %50 = vector.load %arg5[%c0_25, %c0_26, %c0_27] : memref<1x8x128xf32, #tpu.memory_space<vmem>>, vector<1x8x128xf32>
    %51 = vector.shape_cast %50 : vector<1x8x128xf32> to vector<8x128xf32>
    %52 = vector.shape_cast %49 : vector<8x128xf32> to vector<1x8x128xf32>
    tpu.vector_store %arg5[%c0_25, %c0_26, %c0_27], %52 {strides = array<i32>} : memref<1x8x128xf32, #tpu.memory_space<vmem>>, vector<1x8x128xf32>,
    return
  }
  func.func @transform_0(%arg0: i32) -> (i32, i32, i32) {
    %c0_i32 = arith.constant 0 : i32
    %c0_i32_0 = arith.constant 0 : i32
    %c0_i32_1 = arith.constant 0 : i32
    return %arg0, %c0_i32, %c0_i32_0 : i32, i32, i32
  }
  func.func @transform_1(%arg0: i32) -> (i32, i32) {
    %c0_i32 = arith.constant 0 : i32
    %c0_i32_0 = arith.constant 0 : i32
    %c0_i32_1 = arith.constant 0 : i32
    return %c0_i32, %c0_i32_0 : i32, i32
  }
  func.func @transform_2(%arg0: i32) -> (i32, i32) {
    %c0_i32 = arith.constant 0 : i32
    %c0_i32_0 = arith.constant 0 : i32
    %c0_i32_1 = arith.constant 0 : i32
    return %c0_i32, %c0_i32_0 : i32, i32
  }
  func.func @transform_3(%arg0: i32) -> (i32, i32, i32) {
    %c0_i32 = arith.constant 0 : i32
    %c0_i32_0 = arith.constant 0 : i32
    %c0_i32_1 = arith.constant 0 : i32
    %c0_i32_2 = arith.constant 0 : i32
    return %c0_i32, %c0_i32_0, %c0_i32_1 : i32, i32, i32
  }
  func.func @transform_4(%arg0: i32) -> (i32, i32, i32) {
    %c0_i32 = arith.constant 0 : i32
    %c0_i32_0 = arith.constant 0 : i32
    %c0_i32_1 = arith.constant 0 : i32
    return %arg0, %c0_i32, %c0_i32_0 : i32, i32, i32
  }
}

</mosaic_0001>

<bundles_post_ra>
// kernel: tpu_custom_call.1
= control target key start
LH: loop header
LB: loop body
LE: loop exit
PB: predicated region body
PF: predicated region fallthrough
CT: control target
= control target key end

     0   :  { %9 = vsyncpa [#allocation3], 0  ;;  %s1402_s0 = inlined_call_operand.hbm [shape: f32[2,8,64], index: 0, kind: input, shape index: {}]   ;;  %s1403_s1 = inlined_call_operand.hbm [shape: f32[64,256], index: 1, kind: input, shape index: {}]   ;;  %s1404_s2 = inlined_call_operand.vmem [shape: f32[1,256], index: 2, kind: input, shape index: {}]   ;;  %s1405_s3 = inlined_call_operand.hbm [shape: f32[3,128,128], index: 3, kind: input, shape index: {}]   ;;  %s1406_s4 = inlined_call_operand.hbm [shape: f32[2,8,128], index: 4, kind: output, shape index: {}]  }
   0x1   :  { %11 = vsyncpa [#allocation3 + $0x1], 0 }
   0x2   :  { %12 = vsyncpa [#allocation6], 0 }
   0x3   :  { %13 = vsyncpa [#allocation4], 0 }
   0x4   :  { %15 = vsyncpa [#allocation4 + $0x1], 0  ;;  %s1162_s15 = smov 0   ;;  %s1164_s16 = smov 0  }
   0x5   :  { %s1166_s17 = smov 0   ;;  %s1168_s18 = smov 0  }
   0x6 LB: > { %s1183_s19 = sadd.s32 4294967295, %s1125_s18   ;;  %s729_s20 = sadd.s32 4294967294, %s1125_s18   ;;  %s1125_s18 = sphi %s1168_s18, %s1428_s18   ;;  %s1121_s17 = sphi %s1166_s17, %s1427_s17   ;;  %s1117_s16 = sphi %s1164_s16, %s1426_s16   ;;  %s1113_s15 = sphi %s1162_s15, %s1425_s15  }
   0x7   : > { %p41_p0 = scmp.ne.s32.totalorder %s1117_s16, %s1113_s15  ;;  %p1407_p1 = scmp.eq.s32.totalorder %s1183_s19, 0 }
   0x8   : > { %p134_p3 = scmp.eq.s32.totalorder %s729_s20, 1  ;;  %p730_p5 = scmp.ge.s32.totalorder %s1125_s18, 1 }
   0x9   : > { %p1192_p4 = por %p1407_p1, %p41_p0  ;;  %p141_p7 = scmp.lt.s32.totalorder %s1125_s18, 3 }
   0xa   : > { %p1197_p6 = por %p134_p3, %p41_p0  ;;  %s1127_s24 = smov [#allocation5]  }
   0xb   : > { %s1411_s21 = scalar_select %p1192_p4, 1, 0 }
   0xc   : > { %s1412_s22 = scalar_select %p1197_p6, 1, 0 }
   0xd   : > { %p1202_p8 = pnand %p730_p5, %p141_p7  ;;  %s153_s25 = sshll.u32 %s1127_s24, 4  ;;  %s154_s25 = int_to_ptr.vmem [resolvable:$true] %s153_s25 }
   0xe   : > { %s1128_s27 = smov [#allocation7]   ;;  %s988_s29 = scalar_lea.vmem %s154_s25, 2048 }
   0xf   : > { %s1413_s23 = scalar_select %p1202_p8, 1, 0 }
  0x10   : > { %p916_p9 = pneg %p1202_p8  ;;  %s169_s28 = sshll.u32 %s1128_s27, 4  ;;  %s170_s28 = int_to_ptr.vmem [resolvable:$true] %s169_s28 }
  0x11   : > { %p989_p13 = scmp.ne.s32.totalorder %s154_s25, %s988_s29  ;;  %p996_p5 = scmp.lt.s32.totalorder %s154_s25, %s154_s25 }
  0x12   : > { %p1211_p11 = pnand %p916_p9, %p1407_p1  ;;  %p997_p7 = scmp.lt.s32.totalorder %s988_s29, %s988_s29 }
  0x14   : > { %p979_p12 = pneg %p1211_p11  ;;  %p998_p10 = por %p997_p7, %p996_p5 }
  0x16   : > { %p991_p0 = pnand %p989_p13, %p979_p12 }
  0x18   : > { %p992_p3 = pneg %p991_p0 }
  0x1a   : > { %p999_p9 = pnand %p998_p10, %p992_p3 }
  0x1c   : > { %1002 = shalt.err (!%p999_p9)
}
  0x1d   : > { %s1129_s30 = smov 256   ;;  %s1130_s5 = smov 16  }
  0x1e   : > { %919 = dma.hbm_to_vmem [thread:$0]  (!%p1211_p11), %s1403_s1, 2048, %s154_s25, [#allocation6], %s1129_s30, %s1129_s30, %s1130_s5  }
  0x1f   : > { %s1014_s8 = scalar_lea.vmem %s170_s28, 6144  ;;  %p1022_p2 = scmp.lt.s32.totalorder %s170_s28, %s170_s28 }
  0x20   : > { %p1015_p1 = scmp.ne.s32.totalorder %s170_s28, %s1014_s8  ;;  %p1023_p6 = scmp.lt.s32.totalorder %s1014_s8, %s1014_s8 }
  0x22   : > { %p1017_p13 = pnand %p1015_p1, %p979_p12  ;;  %p1024_p5 = por %p1023_p6, %p1022_p2 }
  0x24   : > { %p1018_p0 = pneg %p1017_p13 }
  0x26   : > { %p1025_p10 = pnand %p1024_p5, %p1018_p0 }
  0x28   : > { %1028 = shalt.err (!%p1025_p10)
}
  0x29   : > { %s1131_s9 = smov 128   ;;  %s1132_s10 = smov 8  }
  0x2a   : > { %922 = dma.hbm_to_vmem [thread:$0]  (!%p1211_p11), %s1405_s3, 6144, %s170_s28, [#allocation6], %s1131_s9, %s1131_s9, %s1132_s10  }
  0x2b   : > { %s1234_s13 = sadd.s32 1, %s1125_s18   ;;  %s28_s20 = sadd.s32 1, %s1121_s17 }
  0x2c   : > { %s25_s14 = ssub.s32 %s1125_s18, %s1234_s13  ;;  %p35_p2 = scmp.ne.s32.totalorder %s1121_s17, %s1117_s16 }
  0x2d   : > { %p26_p1 = scmp.eq.s32.totalorder %s25_s14, 0  ;;  %p36_p6 = scmp.eq.s32.totalorder %s1125_s18, 0 }
  0x2e   : > { %p1415_p3 = scmp.eq.s32.totalorder %s1183_s19, 1  ;;  %p933_p9 = scmp.lt.s32.totalorder %s1125_s18, 2 }
  0x2f   : > { %s1243_s24 = scalar_select %p26_p1, %s1121_s17, %s28_s20  }
  0x30   : > { %p37_p12 = por %p36_p6, %p35_p2  ;;  %p1247_p7 = por %p1415_p3, %p35_p2 }
  0x31   : > { %s183_s26 = sand.u32 1, %s1121_s17   ;;  %s735_s28 = sshll.u32 %s1125_s18, 7 }
  0x32   : > { %s1416_s25 = scalar_select %p1247_p7, 1, 0 }
  0x33   : > { %s734_s27 = sshll.u32 %s183_s26, 3  ;;  %s1257_s5 = scalar_lea.hbm %s1402_s0, %s735_s28 }
  0x34   : > { %s187_s6 = scalar_lea.vmem [#allocation2], %s734_s27  ;;  %p1259_p11 = pnand %p933_p9, %p37_p12 }
  0x35   : > { %s194_s7 = sshll.u32 %s187_s6, 4  ;;  %s184_s9 = scalar_lea.sflag [#allocation3], %s183_s26  ;;  %s195_s7 = int_to_ptr.vmem [resolvable:$true] %s194_s7 }
  0x36   : > { %s1029_s10 = scalar_lea.hbm %s1257_s5, 128  ;;  %p1031_p0 = pneg %p1259_p11 }
  0x37   : > { %p1030_p13 = scmp.ne.s32.totalorder %s1257_s5, %s1029_s10  ;;  %s1034_s14 = scalar_lea.hbm %s1402_s0, 256 }
  0x38   : > { %p1035_p1 = scmp.lt.s32.totalorder %s1257_s5, %s1402_s0  ;;  %p1036_p2 = scmp.lt.s32.totalorder %s1034_s14, %s1029_s10 }
  0x39   : > { %p1032_p5 = pnand %p1031_p0, %p1030_p13 }
  0x3a   : > { %p1037_p6 = por %p1036_p2, %p1035_p1 }
  0x3b   : > { %p1033_p10 = pneg %p1032_p5 }
  0x3d   : > { %p1038_p12 = pnand %p1037_p6, %p1033_p10 }
  0x3f   : > { %1041 = shalt.err (!%p1038_p12)
}
  0x40   : > { %s1042_s28 = scalar_lea.vmem %s195_s7, 128  ;;  %s1133_s26 = smov [#allocation2]  }
  0x41   : > { %p1043_p3 = scmp.ne.s32.totalorder %s195_s7, %s1042_s28  ;;  %s1047_s29 = sshll.u32 %s1133_s26, 4  ;;  %s1048_s29 = int_to_ptr.vmem [resolvable:$false] %s1047_s29 }
  0x42   : > { %s1049_s30 = scalar_lea.vmem %s1048_s29, 256  ;;  %p1050_p13 = scmp.lt.s32.totalorder %s195_s7, %s1048_s29 }
  0x43   : > { %p1045_p9 = pnand %p1043_p3, %p1031_p0  ;;  %p1051_p5 = scmp.lt.s32.totalorder %s1049_s30, %s1042_s28 }
  0x45   : > { %p1046_p7 = pneg %p1045_p9  ;;  %p1052_p4 = por %p1051_p5, %p1050_p13 }
  0x47   : > { %p1053_p8 = pnand %p1052_p4, %p1046_p7 }
  0x49   : > { %1056 = shalt.err (!%p1053_p8)
}
  0x4a   : > { %926 = dma.hbm_to_vmem [thread:$0]  (!%p1259_p11), %s1257_s5, 128, %s195_s7, %s184_s9  }
  0x4b   : > { %p1418_p10 = scmp.ne.s32.totalorder %s1413_s23, 0 }
  0x4c   : > { %s1280_s6 = sand.u32 (!%p1418_p10), 1, %s1117_s16   ;;  %p1419_p4 = scmp.ne.s32.totalorder (!%p1418_p10), %s1411_s21, 0 }
  0x4d   : > { %203 = sbr.rel (%p1418_p10) target bundleno = 545 (0x221), region = 36  ;;  %s737_s10 = sshll.u32 (!%p1418_p10), %s1280_s6, 3 }
  0x4e   : > { %s206_s11 = scalar_lea.sflag (!%p1418_p10), [#allocation3], %s1280_s6  ;;  %s1286_s12 = scalar_lea.vmem (!%p1418_p10), [#allocation2], %s737_s10 }
  0x52   : > { %1100 = dma.done.wait (%p1419_p4), %s206_s11, 128  }
  0x53   : > { %1102 = vsyncadd (%p1419_p4), %s206_s11, 4294967168  ;;  %p1420_p8 = scmp.eq.s32.totalorder %s1183_s19, 0 }
  0x55   : > { %1104 = dma.done.wait (%p1420_p8), [#allocation6], 8192   ;;  %p1421_p7 = pmov %p1420_p8 }
  0x56   : > { %v1134_v0 = vmov 0.0   ;;  %v258_v1 = vld [vmem:[#allocation5 + $0x78] sm:$0xff]  ;;  %v257_v2 = vld [vmem:[#allocation5 + $0x70] sm:$0xff]  ;;  %v256_v3 = vld [vmem:[#allocation5 + $0x68] sm:$0xff]  ;;  %vm271_vm0 = vcmask 523264   ;;  %vm1135_vm1 = vmmov 0   ;;  %v261_v50 = vlaneseq }
  0x57   : > { %1106 = vsyncadd (%p1421_p7), [#allocation6], 4294959104  ;;  %339 = vmatprep.mubr.f32.mxu0 %v1134_v0  ;;  %799 = vmatprep.subr.mxu1 %v1134_v0  ;;  %v255_v4 = vld [vmem:[#allocation5 + $0x60] sm:$0xff]  ;;  %v254_v5 = vld [vmem:[#allocation5 + $0x58] sm:$0xff]  ;;  %s745_s5 = sshll.u32 %s1183_s19, 7  ;;  %s241_s7 = scalar_lea.vmem [#allocation8], %s737_s10 }
  0x58   : > { %291 = vmatprep.subr.mxu0 %v258_v1  ;;  %v253_v6 = vld [vmem:[#allocation5 + $0x50] sm:$0xff]  ;;  %v252_v7 = vld [vmem:[#allocation5 + $0x48] sm:$0xff]  ;;  %v251_v8 = vld [vmem:[#allocation5 + $0x40] sm:$0xff]  ;;  %831 = vmatprep.mubr.msk.f32.mxu1 %vm1135_vm1, %v1134_v0  ;;  %v1335_v51 = vshrl.u32 %v261_v50, 7  ;;  %s640_s8 = sshll.u32 %s241_s7, 4  ;;  %s638_s20 = scalar_lea.hbm %s1406_s4, %s745_s5  ;;  %s641_s8 = int_to_ptr.vmem [resolvable:$true] %s640_s8 }
  0x59   : > { %292 = vmatpush1.msra.mxu0 %v257_v2  ;;  %v250_v9 = vld [vmem:[#allocation5 + $0x38] sm:$0xff]  ;;  %v369_v11 = vld [vmem:[#allocation7 + $0x70] sm:$0xff]  ;;  %v248_v13 = vld [vmem:[#allocation5 + $0x28] sm:$0xff]  ;;  %s627_s27 = scalar_lea.sflag [#allocation4], %s1280_s6  ;;  %s1057_s28 = scalar_lea.vmem %s641_s8, 128 }
  0x5a   : > { %293 = vmatprep.subr.mxu0 %v256_v3  ;;  %v370_v10 = vld [vmem:[#allocation7 + $0x78] sm:$0xff]  ;;  %v249_v12 = vld [vmem:[#allocation5 + $0x30] sm:$0xff]  ;;  %v368_v14 = vld [vmem:[#allocation7 + $0x68] sm:$0xff]  ;;  %v263_v52 = vsub.s32 0, %v1335_v51  ;;  %v350_v56 = vadd.s32 4294967295, %v1335_v51  ;;  %p1058_p11 = scmp.ne.s32.totalorder %s641_s8, %s1057_s28  ;;  %p1422_p0 = scmp.ne.s32.totalorder %s1416_s25, 0 }
  0x5b   : > { %294 = vmatpush1.msra.mxu0 %v255_v4  ;;  %800 = vmatpush3.msra.mxu1 %v370_v10  ;;  %v247_v15 = vld [vmem:[#allocation5 + $0x20] sm:$0xff]  ;;  %v246_v16 = vld [vmem:[#allocation5 + $0x18] sm:$0xff]  ;;  %v245_v18 = vld [vmem:[#allocation5 + $0x10] sm:$0xff]  ;;  %s1136_s26 = smov [#allocation8]  }
  0x5c   : > { %295 = vmatprep.subr.mxu0 %v254_v5  ;;  %801 = vmatprep.subr.mxu1 %v1134_v0  ;;  %v367_v17 = vld [vmem:[#allocation7 + $0x60] sm:$0xff]  ;;  %v244_v19 = vld [vmem:[#allocation5 + $0x8] sm:$0xff]  ;;  %v366_v20 = vld [vmem:[#allocation7 + $0x58] sm:$0xff]  ;;  %vm351_vm2 = vcmp.ge.s32.totalorder %v350_v56, 0  ;;  %p1059_p1 = pnand %p1058_p11, %p1422_p0  ;;  %s1061_s19 = sshll.u32 %s1136_s26, 4  ;;  %s1062_s19 = int_to_ptr.vmem [resolvable:$false] %s1061_s19 }
  0x5d   : > { %296 = vmatpush1.msra.mxu0 %v253_v6  ;;  %802 = vmatpush3.msra.mxu1 %v369_v11  ;;  %v243_v21 = vld [vmem:[#allocation5] sm:$0xff]  ;;  %v242_v22 = vld [vmem:[%s1286_s12] sm:$0xff]  ;;  %v364_v26 = vld [vmem:[#allocation7 + $0x48] sm:$0xff]  ;;  %v531_v11 = vadd.s32 1, %v1335_v51  ;;  %s1063_s29 = scalar_lea.vmem %s1062_s19, 256  ;;  %p1064_p6 = scmp.lt.s32.totalorder %s641_s8, %s1062_s19 }
  0x5e   : > { %297 = vmatprep.subr.mxu0 %v252_v7  ;;  %803 = vmatprep.subr.mxu1 %v1134_v0  ;;  %v458_v23 = vld [vmem:[#allocation7 + $0xf8] sm:$0xff]  ;;  %v365_v24 = vld [vmem:[#allocation7 + $0x50] sm:$0xff]  ;;  %v456_v27 = vld [vmem:[#allocation7 + $0xe8] sm:$0xff]  ;;  %p1060_p2 = pneg %p1059_p1  ;;  %p1065_p12 = scmp.lt.s32.totalorder %s1063_s29, %s1057_s28 }
  0x5f   : > { %298 = vmatpush1.msra.mxu0 %v251_v8  ;;  %804 = vmatpush3.msra.mxu1 %v368_v14  ;;  %v457_v25 = vld [vmem:[#allocation7 + $0xf0] sm:$0xff]  ;;  %v363_v28 = vld [vmem:[#allocation7 + $0x40] sm:$0xff]  ;;  %v362_v30 = vld [vmem:[#allocation7 + $0x38] sm:$0xff]  ;;  %vm533_vm3 = vcmp.lt.s32.totalorder %v531_v11, 8 }
  0x60   : > { %299 = vmatprep.subr.mxu0 %v250_v9  ;;  %805 = vmatprep.subr.mxu1 %v1134_v0  ;;  %v455_v29 = vld [vmem:[#allocation7 + $0xe0] sm:$0xff]  ;;  %v454_v31 = vld [vmem:[#allocation7 + $0xd8] sm:$0xff]  ;;  %v361_v32 = vld [vmem:[#allocation7 + $0x30] sm:$0xff]  ;;  %p1066_p3 = por %p1065_p12, %p1064_p6 }
  0x61   : > { %300 = vmatpush1.msra.mxu0 %v249_v12  ;;  %806 = vmatpush3.msra.mxu1 %v367_v17  ;;  %v453_v33 = vld [vmem:[#allocation7 + $0xd0] sm:$0xff]  ;;  %v360_v34 = vld [vmem:[#allocation7 + $0x28] sm:$0xff]  ;;  %v359_v36 = vld [vmem:[#allocation7 + $0x20] sm:$0xff] }
  0x62   : > { %301 = vmatprep.subr.mxu0 %v248_v13  ;;  %807 = vmatprep.subr.mxu1 %v1134_v0  ;;  %v452_v35 = vld [vmem:[#allocation7 + $0xc8] sm:$0xff]  ;;  %v451_v37 = vld [vmem:[#allocation7 + $0xc0] sm:$0xff]  ;;  %v358_v38 = vld [vmem:[#allocation7 + $0x18] sm:$0xff]  ;;  %p1067_p9 = pnand %p1066_p3, %p1060_p2 }
  0x63   : > { %302 = vmatpush1.msra.mxu0 %v247_v15  ;;  %808 = vmatpush3.msra.mxu1 %v366_v20  ;;  %v450_v39 = vld [vmem:[#allocation7 + $0xb8] sm:$0xff]  ;;  %v449_v40 = vld [vmem:[#allocation7 + $0xb0] sm:$0xff]  ;;  %v448_v41 = vld [vmem:[#allocation7 + $0xa8] sm:$0xff]  ;;  %v267_v20 = vsub.s32 1, %v1335_v51 }
  0x64   : > { %303 = vmatprep.subr.mxu0 %v246_v16  ;;  %809 = vmatprep.subr.mxu1 %v1134_v0  ;;  %v447_v42 = vld [vmem:[#allocation7 + $0xa0] sm:$0xff]  ;;  %v446_v43 = vld [vmem:[#allocation7 + $0x98] sm:$0xff]  ;;  %v445_v44 = vld [vmem:[#allocation7 + $0x90] sm:$0xff] }
  0x65   : > { %304 = vmatpush1.msra.mxu0 %v245_v18  ;;  %810 = vmatpush3.msra.mxu1 %v365_v24  ;;  %v357_v45 = vld [vmem:[#allocation7 + $0x10] sm:$0xff]  ;;  %v444_v46 = vld [vmem:[#allocation7 + $0x88] sm:$0xff]  ;;  %v443_v48 = vld [vmem:[#allocation7 + $0x80] sm:$0xff] }
  0x66   : > { %305 = vmatprep.subr.mxu0 %v244_v19  ;;  %811 = vmatprep.subr.mxu1 %v1134_v0  ;;  %v356_v47 = vld [vmem:[#allocation7 + $0x8] sm:$0xff]  ;;  %v355_v49 = vld [vmem:[#allocation7] sm:$0xff]  ;;  %v1341_v53 = vld [vmem:[%s1404_s2] sm:$0x3] }
  0x67   : > { %306 = vmatpush1.msra.mxu0 %v243_v21  ;;  %812 = vmatpush3.msra.mxu1 %v364_v26  ;;  %v264_v54 = vrot.slane %v1341_v53, %v263_v52  ;;  %v552_v60 = vld [vmem:[#allocation7 + $0x178] sm:$0xff]  ;;  %v551_v61 = vld [vmem:[#allocation7 + $0x170] sm:$0xff]  ;;  %v550_v62 = vld [vmem:[#allocation7 + $0x168] sm:$0xff]  ;;  %v268_v21 = vrot.slane %v1341_v53, %v267_v20 }
  0x68   : > { %741 = vmatmul.mubr.msk.f32.vlgmr.msra.gmra.mxu0 %vm271_vm0, %v242_v22  ;;  %834 = vmatprep.subr.mxu0 %v1134_v0  ;;  %v549_v63 = vld [vmem:[#allocation7 + $0x160] sm:$0xff]  ;;  %v548_v1 = vld [vmem:[#allocation7 + $0x158] sm:$0xff]  ;;  %v547_v2 = vld [vmem:[#allocation7 + $0x150] sm:$0xff] }
  0x69   : > { %835 = vmatpush3.msra.mxu0 %v458_v23  ;;  %813 = vmatprep.subr.mxu1 %v1134_v0  ;;  %v546_v3 = vld [vmem:[#allocation7 + $0x148] sm:$0xff]  ;;  %v545_v4 = vld [vmem:[#allocation7 + $0x140] sm:$0xff]  ;;  %v544_v5 = vld [vmem:[#allocation7 + $0x138] sm:$0xff] }
  0x6a   : > { %836 = vmatprep.subr.mxu0 %v1134_v0  ;;  %814 = vmatpush3.msra.mxu1 %v363_v28  ;;  %v543_v6 = vld [vmem:[#allocation7 + $0x130] sm:$0xff]  ;;  %v542_v7 = vld [vmem:[#allocation7 + $0x128] sm:$0xff]  ;;  %v541_v8 = vld [vmem:[#allocation7 + $0x120] sm:$0xff] }
  0x6b   : > { %837 = vmatpush3.msra.mxu0 %v457_v25  ;;  %815 = vmatprep.subr.mxu1 %v1134_v0  ;;  %v540_v9 = vld [vmem:[#allocation7 + $0x118] sm:$0xff]  ;;  %v539_v10 = vld [vmem:[#allocation7 + $0x110] sm:$0xff]  ;;  %v538_v12 = vld [vmem:[#allocation7 + $0x108] sm:$0xff] }
  0x6c   : > { %838 = vmatprep.subr.mxu0 %v1134_v0  ;;  %816 = vmatpush3.msra.mxu1 %v362_v30  ;;  %v537_v13 = vld [vmem:[#allocation7 + $0x100] sm:$0xff] }
  0x6d   : > { %839 = vmatpush3.msra.mxu0 %v456_v27  ;;  %817 = vmatprep.subr.mxu1 %v1134_v0 }
  0x6e   : > { %840 = vmatprep.subr.mxu0 %v1134_v0  ;;  %818 = vmatpush3.msra.mxu1 %v361_v32 }
  0x6f   : > { %841 = vmatpush3.msra.mxu0 %v455_v29  ;;  %819 = vmatprep.subr.mxu1 %v1134_v0 }
  0x70   : > { %842 = vmatprep.subr.mxu0 %v1134_v0  ;;  %820 = vmatpush3.msra.mxu1 %v360_v34 }
  0x71   : > { %843 = vmatpush3.msra.mxu0 %v454_v31  ;;  %821 = vmatprep.subr.mxu1 %v1134_v0 }
  0x72   : > { %844 = vmatprep.subr.mxu0 %v1134_v0  ;;  %822 = vmatpush3.msra.mxu1 %v359_v36 }
  0x73   : > { %845 = vmatpush3.msra.mxu0 %v453_v33  ;;  %823 = vmatprep.subr.mxu1 %v1134_v0 }
  0x74   : > { %846 = vmatprep.subr.mxu0 %v1134_v0  ;;  %824 = vmatpush3.msra.mxu1 %v358_v38 }
  0x75   : > { %847 = vmatpush3.msra.mxu0 %v452_v35  ;;  %825 = vmatprep.subr.mxu1 %v1134_v0 }
  0x76   : > { %848 = vmatprep.subr.mxu0 %v1134_v0  ;;  %826 = vmatpush3.msra.mxu1 %v357_v45 }
  0x77   : > { %849 = vmatpush3.msra.mxu0 %v451_v37  ;;  %827 = vmatprep.subr.mxu1 %v1134_v0 }
  0x78   : > { %850 = vmatprep.subr.mxu0 %v1134_v0  ;;  %828 = vmatpush3.msra.mxu1 %v356_v47 }
  0x79   : > { %851 = vmatpush3.msra.mxu0 %v450_v39  ;;  %829 = vmatprep.subr.mxu1 %v1134_v0 }
  0x7a   : > { %852 = vmatprep.subr.mxu0 %v1134_v0  ;;  %866 = vmatprep.mubr.msk.f32.mxu0 %vm1135_vm1, %v1134_v0 }
  0x7b   : > { %853 = vmatpush3.msra.mxu0 %v449_v40  ;;  %830 = vmatpush3.msra.mxu1 %v355_v49 }
  0x7c   : > { %854 = vmatprep.subr.mxu0 %v1134_v0  ;;  %869 = vmatprep.subr.mxu1 %v1134_v0 }
  0x7d   : > { %855 = vmatpush3.msra.mxu0 %v448_v41 }
  0x7e   : > { %856 = vmatprep.subr.mxu0 %v1134_v0 }
  0x7f   : > { %857 = vmatpush3.msra.mxu0 %v447_v42 }
  0x80   : > { %858 = vmatprep.subr.mxu0 %v1134_v0 }
  0x81   : > { %859 = vmatpush3.msra.mxu0 %v446_v43 }
  0x82   : > { %860 = vmatprep.subr.mxu0 %v1134_v0 }
  0x83   : > { %861 = vmatpush3.msra.mxu0 %v445_v44 }
  0x84   : > { %862 = vmatprep.subr.mxu0 %v1134_v0 }
  0x85   : > { %863 = vmatpush3.msra.mxu0 %v444_v46 }
  0x86   : > { %864 = vmatprep.subr.mxu0 %v1134_v0 }
  0x87   : > { %865 = vmatpush3.msra.mxu0 %v443_v48 }
 0x128   : > { %v341_v55 = vpop.f32.mrf.mxu0 }
 0x129   : > { %v342_v57 = vadd.f32 %v341_v55, %v264_v54 }
 0x12a   : > { %v343_v15 = vpop.f32.mrf.mxu0 }
 0x12b   : > { %v346_v58 = vmax.f32 %v342_v57, 0.0  ;;  %v344_v22 = vadd.f32 %v343_v15, %v268_v21 }
 0x12d   : > { %v349_v59 = vrot.slane %v346_v58, 7  ;;  %867 = vmatmul.mubr.f32.vlgmr.msra.gmra.mxu0 %v346_v58  ;;  %v530_v14 = vrot.slane %v346_v58, 1 }
 0x12f   : > { %832 = vmatmul.mubr.msk.f32.vlgmr.msra.gmra.mxu1 %vm351_vm2, %v349_v59 }
 0x130   : > { %870 = vmatpush3.msra.mxu1 %v552_v60  ;;  %901 = vmatprep.mubr.msk.f32.mxu1 %vm1135_vm1, %v1134_v0 }
 0x131   : > { %871 = vmatprep.subr.mxu1 %v1134_v0 }
 0x132   : > { %872 = vmatpush3.msra.mxu1 %v551_v61 }
 0x133   : > { %873 = vmatprep.subr.mxu1 %v1134_v0 }
 0x134   : > { %874 = vmatpush3.msra.mxu1 %v550_v62 }
 0x135   : > { %875 = vmatprep.subr.mxu1 %v1134_v0 }
 0x136   : > { %876 = vmatpush3.msra.mxu1 %v549_v63 }
 0x137   : > { %877 = vmatprep.subr.mxu1 %v1134_v0 }
 0x138   : > { %878 = vmatpush3.msra.mxu1 %v548_v1 }
 0x139   : > { %879 = vmatprep.subr.mxu1 %v1134_v0 }
 0x13a   : > { %880 = vmatpush3.msra.mxu1 %v547_v2 }
 0x13b   : > { %881 = vmatprep.subr.mxu1 %v1134_v0 }
 0x13c   : > { %882 = vmatpush3.msra.mxu1 %v546_v3 }
 0x13d   : > { %883 = vmatprep.subr.mxu1 %v1134_v0 }
 0x13e   : > { %884 = vmatpush3.msra.mxu1 %v545_v4 }
 0x13f   : > { %885 = vmatprep.subr.mxu1 %v1134_v0 }
 0x140   : > { %886 = vmatpush3.msra.mxu1 %v544_v5 }
 0x141   : > { %887 = vmatprep.subr.mxu1 %v1134_v0 }
 0x142   : > { %888 = vmatpush3.msra.mxu1 %v543_v6 }
 0x143   : > { %889 = vmatprep.subr.mxu1 %v1134_v0 }
 0x144   : > { %890 = vmatpush3.msra.mxu1 %v542_v7 }
 0x145   : > { %891 = vmatprep.subr.mxu1 %v1134_v0 }
 0x146   : > { %892 = vmatpush3.msra.mxu1 %v541_v8 }
 0x147   : > { %893 = vmatprep.subr.mxu1 %v1134_v0 }
 0x148   : > { %894 = vmatpush3.msra.mxu1 %v540_v9 }
 0x149   : > { %895 = vmatprep.subr.mxu1 %v1134_v0 }
 0x14a   : > { %896 = vmatpush3.msra.mxu1 %v539_v10 }
 0x14b   : > { %897 = vmatprep.subr.mxu1 %v1134_v0 }
 0x14c   : > { %898 = vmatpush3.msra.mxu1 %v538_v12 }
 0x14d   : > { %899 = vmatprep.subr.mxu1 %v1134_v0 }
 0x14e   : > { %900 = vmatpush3.msra.mxu1 %v537_v13 }
 0x14f   : > { %902 = vmatmul.mubr.msk.f32.vlgmr.msra.gmra.mxu1 %vm533_vm3, %v530_v14 }
 0x1ed   : > { %v525_v16 = vpop.f32.mrf.mxu0 }
 0x1ef   : > { %v437_v17 = vpop.f32.mrf.mxu1  ;;  %v868_v18 = vpop.f32.mrf.mxu0 }
 0x1f0   : > { %v441_v23 = vadd.f32 %v437_v17, %v344_v22 }
 0x1f1   : > { %v833_v19 = vpop.f32.mrf.mxu1 }
 0x1f2   : > { %v529_v24 = vadd.f32 %v525_v16, %v441_v23 }
 0x20f   : > { %v619_v25 = vpop.f32.mrf.mxu1 }
 0x210   : > { %v623_v0 = vadd.f32 %v619_v25, %v529_v24 }
 0x211   : > { %v903_v26 = vpop.f32.mrf.mxu1 }
 0x212   : > { %v624_v27 = vmax.f32 %v623_v0, 0.0 }
 0x214   : > { %625 = vst [vmem:[%s241_s7] sm:$0xff] %v624_v27 }
 0x215   : > { %1070 = shalt.err (!%p1067_p9)
}
 0x216   : > { %s1071_s30 = scalar_lea.hbm %s638_s20, 128  ;;  %s1075_s11 = scalar_lea.hbm %s1406_s4, 256 }
 0x217   : > { %p1072_p13 = scmp.ne.s32.totalorder %s638_s20, %s1071_s30  ;;  %p1076_p4 = scmp.lt.s32.totalorder %s638_s20, %s1406_s4 }
 0x218   : > { %p1077_p8 = scmp.lt.s32.totalorder %s1075_s11, %s1071_s30 }
 0x219   : > { %p1073_p5 = pnand %p1072_p13, %p1422_p0 }
 0x21a   : > { %p1078_p7 = por %p1077_p8, %p1076_p4 }
 0x21b   : > { %p1074_p10 = pneg %p1073_p5 }
 0x21d   : > { %p1079_p11 = pnand %p1078_p7, %p1074_p10 }
 0x21f   : > { %1082 = shalt.err (!%p1079_p11)
}
 0x220   : > { %914 = dma.vmem_to_hbm [thread:$0]  (%p1422_p0), %s641_s8, 128, %s638_s20, %s627_s27  }
 0x221 PF: > { %s652_s23 = sand.u32 1, %s1113_s15   ;;  %p1423_p1 = scmp.ne.s32.totalorder %s1412_s22, 0 }
 0x222   : > { %p1424_p2 = scmp.ge.s32.totalorder %s1125_s18, 2  ;;  %s653_s5 = scalar_lea.sflag [#allocation4], %s652_s23 }
 0x224   : > { %p928_p6 = pnand %p1424_p2, %p1423_p1 }
 0x226   : > { %p929_p12 = pneg %p928_p6 }
 0x228   : > { %1108 = dma.done.wait (%p929_p12), %s653_s5, 128  }
 0x229   : > { %1110 = vsyncadd (%p929_p12), %s653_s5, 4294967168  ;;  %p18_p3 = scmp.ge.s32.totalorder %s1234_s13, 4   ;;  %s1425_s15 = smov %s1117_s16 }
 0x22a   : > { %s1426_s16 = smov %s1121_s17  ;;  %s1427_s17 = smov %s1243_s24 }
 0x22b   : > { %s1428_s18 = smov %s1234_s13  ;;  %20 = sbr.rel (!%p18_p3) target bundleno = 6 (0x6), region = 91 }
 0x230   :  { %658 = vsyncpa [#allocation3], 1 }
 0x231   :  { %660 = vsyncpa [#allocation3 + $0x1], 1 }
 0x232   :  { %661 = vsyncpa [#allocation6], 1 }
 0x233   :  { %662 = vsyncpa [#allocation4], 1 }
 0x234   :  { %664 = vsyncpa [#allocation4 + $0x1], 1 }

</bundles_post_ra>
